<compile_context>
chip_gen: v6e
topology: v6e:2x2x1
jax: 0.10.0
libtpu: 0.0.40
codegen_flags: <defaults>
</compile_context>

<pallas_src>
import functools

import jax
import jax.numpy as jnp
from jax.experimental import pallas as pl
from jax.experimental.pallas import tpu as pltpu


def _round_up(x, m):
    return ((x + m - 1) // m) * m


def _mlp_kernel(x_ref, w1_ref, b1_ref, w2_ref, b2_ref, w3_ref, b3_ref, o_ref):
    # Matmul operand dtype (f32 or bf16); accumulation is always f32.
    mm_dtype = w1_ref.dtype

    # fc1 + ReLU
    h = jnp.dot(x_ref[...], w1_ref[...], preferred_element_type=jnp.float32)
    h = jnp.maximum(h + b1_ref[...], 0.0)
    # fc2 + ReLU
    h = jnp.dot(h.astype(mm_dtype), w2_ref[...],
                preferred_element_type=jnp.float32)
    h = jnp.maximum(h + b2_ref[...], 0.0)
    # fc3 (no activation)
    h = jnp.dot(h.astype(mm_dtype), w3_ref[...],
                preferred_element_type=jnp.float32)
    o_ref[...] = (h + b3_ref[...]).astype(o_ref.dtype)


@functools.partial(jax.jit, static_argnames=("batch_tile", "use_bf16"))
def predictor_forward(x, w1, b1, w2, b2, w3, b3, *,
                      batch_tile=256, use_bf16=False):
    """Runs the Predictor MLP forward pass as a single fused Pallas kernel.

    Args:
      x:  (B, conv_output_size) float32
      w1: (conv_output_size, hidden) float32   (already transposed vs torch)
      b1: (1, hidden)
      w2: (hidden, hidden)
      b2: (1, hidden)
      w3: (hidden, 128)
      b3: (1, 128)
      batch_tile: rows of x processed per grid step (multiple of 8; 256-1024
        recommended on v6e/v7x, <=512 on v5e).
      use_bf16: cast x and weights to bf16 for the MXU matmuls (f32 accumulate).
    Returns:
      (B, 128) float32
    """
    B, D_in = x.shape
    H = w1.shape[1]
    D_out = w3.shape[1]

    # --- K padding: 576 -> 640 (next multiple of 128) for clean lane tiles. ---
    D_in_pad = _round_up(D_in, 128)
    if D_in_pad != D_in:
        x = jnp.pad(x, ((0, 0), (0, D_in_pad - D_in)))
        w1 = jnp.pad(w1, ((0, D_in_pad - D_in), (0, 0)))

    # --- Batch tiling: clamp tile to the (8-aligned) batch, pad the tail. ---
    tile = max(8, min(_round_up(batch_tile, 8), _round_up(B, 8)))
    B_pad = _round_up(B, tile)
    if B_pad != B:
        x = jnp.pad(x, ((0, B_pad - B), (0, 0)))

    # --- Optional bf16 matmul operands (biases / accumulation stay f32). ---
    if use_bf16:
        x = x.astype(jnp.bfloat16)
        w1 = w1.astype(jnp.bfloat16)
        w2 = w2.astype(jnp.bfloat16)
        w3 = w3.astype(jnp.bfloat16)

    grid = (B_pad // tile,)

    # Weights/biases live fully in VMEM (constant index_map => fetched once);
    # only the batch dimension streams across the (parallel) grid.
    x_spec = pl.BlockSpec((tile, D_in_pad), lambda i: (i, 0))
    w1_spec = pl.BlockSpec((D_in_pad, H), lambda i: (0, 0))
    b1_spec = pl.BlockSpec((1, H), lambda i: (0, 0))
    w2_spec = pl.BlockSpec((H, H), lambda i: (0, 0))
    b2_spec = pl.BlockSpec((1, H), lambda i: (0, 0))
    w3_spec = pl.BlockSpec((H, D_out), lambda i: (0, 0))
    b3_spec = pl.BlockSpec((1, D_out), lambda i: (0, 0))
    o_spec = pl.BlockSpec((tile, D_out), lambda i: (i, 0))

    itemsize = jnp.dtype(x.dtype).itemsize
    flops = 2 * B_pad * (D_in_pad * H + H * H + H * D_out)
    bytes_accessed = (
        B_pad * D_in_pad * itemsize                      # x stream
        + B_pad * D_out * 4                              # output
        + (D_in_pad * H + H * H + H * D_out) * itemsize  # weights
        + (2 * H + D_out) * 4                            # biases
    )

    out = pl.pallas_call(
        _mlp_kernel,
        out_shape=jax.ShapeDtypeStruct((B_pad, D_out), jnp.float32),
        grid_spec=pltpu.PrefetchScalarGridSpec(
            num_scalar_prefetch=0,
            grid=grid,
            in_specs=[x_spec, w1_spec, b1_spec, w2_spec, b2_spec,
                      w3_spec, b3_spec],
            out_specs=o_spec,
        ),
        compiler_params=pltpu.CompilerParams(
            dimension_semantics=("parallel",),
        ),
        cost_estimate=pl.CostEstimate(
            flops=flops, transcendentals=0, bytes_accessed=bytes_accessed),
    )(x, w1, b1, w2, b2, w3, b3)

    return out[:B]


def init_params(key, conv_output_size, hidden_size, out_size=128):
    """Deterministic synthetic init matching nn.Linear shapes.

    PyTorch Linear stores W as (out, in); we generate in that convention and
    transpose to (in, out) for the kernel.
    """
    ks = jax.random.split(key, 6)

    def linear(kw, kb, fan_in, fan_out):
        bound = 1.0 / jnp.sqrt(fan_in)
        w = jax.random.uniform(kw, (fan_out, fan_in), jnp.float32, -bound, bound)
        b = jax.random.uniform(kb, (fan_out,), jnp.float32, -bound, bound)
        return w.T, b.reshape(1, fan_out)

    w1, b1 = linear(ks[0], ks[1], conv_output_size, hidden_size)
    w2, b2 = linear(ks[2], ks[3], hidden_size, hidden_size)
    w3, b3 = linear(ks[4], ks[5], hidden_size, out_size)
    return w1, b1, w2, b2, w3, b3


if __name__ == "__main__":
    # args.architecture = 'data-efficient' -> conv_output_size = 576
    # args.hidden_size  = 128
    CONV_OUT = 576
    HIDDEN = 128
    BATCH = 200  # not a tile multiple -> exercises tail padding; grid == 2

    key = jax.random.PRNGKey(0)
    k_x, k_p = jax.random.split(key)

    x = jax.random.normal(k_x, (BATCH, CONV_OUT), jnp.float32)
    params = init_params(k_p, CONV_OUT, HIDDEN)

    # f32 path (strict check).
    out = predictor_forward(x, *params, batch_tile=128)
    out = jax.block_until_ready(out)

    # Pure-JAX reference check.
    w1, b1, w2, b2, w3, b3 = params
    ref = jnp.maximum(x @ w1 + b1, 0.0)
    ref = jnp.maximum(ref @ w2 + b2, 0.0)
    ref = ref @ w3 + b3
    assert out.shape == (BATCH, 128), out.shape
    assert jnp.allclose(out, ref, atol=1e-4, rtol=1e-4), float(
        jnp.max(jnp.abs(out - ref))
    )

    # bf16 matmul path (inference-grade, loose tolerance vs f32 reference).
    out_bf16 = jax.block_until_ready(
        predictor_forward(x, *params, batch_tile=128, use_bf16=True))
    assert out_bf16.shape == (BATCH, 128), out_bf16.shape
    assert bool(jnp.all(jnp.isfinite(out_bf16)))
    assert float(jnp.max(jnp.abs(out_bf16 - ref))) < 0.25

    print("KERNEL_OK")
</pallas_src>

<mosaic_0001>
module attributes {stable_mosaic.version = 11 : i64} {
  func.func @_mlp_kernel(%arg0: i32, %arg1: memref<128x640xf32, #tpu.memory_space<vmem>>, %arg2: memref<640x128xf32, #tpu.memory_space<vmem>>, %arg3: memref<1x128xf32, #tpu.memory_space<vmem>>, %arg4: memref<128x128xf32, #tpu.memory_space<vmem>>, %arg5: memref<1x128xf32, #tpu.memory_space<vmem>>, %arg6: memref<128x128xf32, #tpu.memory_space<vmem>>, %arg7: memref<1x128xf32, #tpu.memory_space<vmem>>, %arg8: memref<128x128xf32, #tpu.memory_space<vmem>>) attributes {dimension_semantics = [#tpu.dimension_semantics<parallel>], iteration_bounds = array<i64: 2>, scalar_prefetch = 0 : i64, scratch_operands = 0 : i64, tpu.core_type = #tpu.core_type<tc>, window_params = [{transform_indices = @transform_0, window_bounds = array<i64: 128, 640>}, {pipeline_mode = #tpu.pipeline_mode<synchronous>, transform_indices = @transform_1, window_bounds = array<i64: 640, 128>}, {pipeline_mode = #tpu.pipeline_mode<synchronous>, transform_indices = @transform_2, window_bounds = array<i64: 1, 128>}, {pipeline_mode = #tpu.pipeline_mode<synchronous>, transform_indices = @transform_3, window_bounds = array<i64: 128, 128>}, {pipeline_mode = #tpu.pipeline_mode<synchronous>, transform_indices = @transform_4, window_bounds = array<i64: 1, 128>}, {pipeline_mode = #tpu.pipeline_mode<synchronous>, transform_indices = @transform_5, window_bounds = array<i64: 128, 128>}, {pipeline_mode = #tpu.pipeline_mode<synchronous>, transform_indices = @transform_6, window_bounds = array<i64: 1, 128>}, {transform_indices = @transform_7, window_bounds = array<i64: 128, 128>}]} {
    %c0 = arith.constant 0 : index
    %c0_0 = arith.constant 0 : index
    %0 = vector.load %arg1[%c0, %c0_0] : memref<128x640xf32, #tpu.memory_space<vmem>>, vector<128x640xf32>
    %c0_1 = arith.constant 0 : index
    %c0_2 = arith.constant 0 : index
    %1 = vector.load %arg2[%c0_1, %c0_2] : memref<640x128xf32, #tpu.memory_space<vmem>>, vector<640x128xf32>
    %cst = arith.constant dense<0.000000e+00> : vector<128x128xf32>
    %2 = tpu.matmul %0, %1, %cst {dimension_numbers = #tpu.dot_dimension_numbers<[1], [0], [0], [1], [0, 0, 1, 1], [], []>} : vector<128x640xf32>, vector<640x128xf32>, vector<128x128xf32> -> vector<128x128xf32>
    %c0_3 = arith.constant 0 : index
    %c0_4 = arith.constant 0 : index
    %3 = vector.load %arg3[%c0_3, %c0_4] : memref<1x128xf32, #tpu.memory_space<vmem>>, vector<1x128xf32>
    %4 = vector.broadcast %3 : vector<1x128xf32> to vector<128x128xf32>
    %5 = arith.addf %2, %4 : vector<128x128xf32>
    %cst_5 = arith.constant 0.000000e+00 : f32
    %6 = vector.broadcast %cst_5 : f32 to vector<128x128xf32>
    %7 = arith.maximumf %5, %6 : vector<128x128xf32>
    %c0_6 = arith.constant 0 : index
    %c0_7 = arith.constant 0 : index
    %8 = vector.load %arg4[%c0_6, %c0_7] : memref<128x128xf32, #tpu.memory_space<vmem>>, vector<128x128xf32>
    %cst_8 = arith.constant dense<0.000000e+00> : vector<128x128xf32>
    %9 = tpu.matmul %7, %8, %cst_8 {dimension_numbers = #tpu.dot_dimension_numbers<[1], [0], [0], [1], [0, 0, 1, 1], [], []>} : vector<128x128xf32>, vector<128x128xf32>, vector<128x128xf32> -> vector<128x128xf32>
    %c0_9 = arith.constant 0 : index
    %c0_10 = arith.constant 0 : index
    %10 = vector.load %arg5[%c0_9, %c0_10] : memref<1x128xf32, #tpu.memory_space<vmem>>, vector<1x128xf32>
    %11 = vector.broadcast %10 : vector<1x128xf32> to vector<128x128xf32>
    %12 = arith.addf %9, %11 : vector<128x128xf32>
    %cst_11 = arith.constant 0.000000e+00 : f32
    %13 = vector.broadcast %cst_11 : f32 to vector<128x128xf32>
    %14 = arith.maximumf %12, %13 : vector<128x128xf32>
    %c0_12 = arith.constant 0 : index
    %c0_13 = arith.constant 0 : index
    %15 = vector.load %arg6[%c0_12, %c0_13] : memref<128x128xf32, #tpu.memory_space<vmem>>, vector<128x128xf32>
    %cst_14 = arith.constant dense<0.000000e+00> : vector<128x128xf32>
    %16 = tpu.matmul %14, %15, %cst_14 {dimension_numbers = #tpu.dot_dimension_numbers<[1], [0], [0], [1], [0, 0, 1, 1], [], []>} : vector<128x128xf32>, vector<128x128xf32>, vector<128x128xf32> -> vector<128x128xf32>
    %c0_15 = arith.constant 0 : index
    %c0_16 = arith.constant 0 : index
    %17 = vector.load %arg7[%c0_15, %c0_16] : memref<1x128xf32, #tpu.memory_space<vmem>>, vector<1x128xf32>
    %18 = vector.broadcast %17 : vector<1x128xf32> to vector<128x128xf32>
    %19 = arith.addf %16, %18 : vector<128x128xf32>
    %c0_17 = arith.constant 0 : index
    %c0_18 = arith.constant 0 : index
    %20 = vector.load %arg8[%c0_17, %c0_18] : memref<128x128xf32, #tpu.memory_space<vmem>>, vector<128x128xf32>
    tpu.vector_store %arg8[%c0_17, %c0_18], %19 {strides = array<i32>} : memref<128x128xf32, #tpu.memory_space<vmem>>, vector<128x128xf32>,
    return
  }
  func.func @transform_0(%arg0: i32) -> (i32, i32) {
    %c0_i32 = arith.constant 0 : i32
    %c0_i32_0 = arith.constant 0 : i32
    return %arg0, %c0_i32 : i32, i32
  }
  func.func @transform_1(%arg0: i32) -> (i32, i32) {
    %c0_i32 = arith.constant 0 : i32
    %c0_i32_0 = arith.constant 0 : i32
    %c0_i32_1 = arith.constant 0 : i32
    return %c0_i32, %c0_i32_0 : i32, i32
  }
  func.func @transform_2(%arg0: i32) -> (i32, i32) {
    %c0_i32 = arith.constant 0 : i32
    %c0_i32_0 = arith.constant 0 : i32
    %c0_i32_1 = arith.constant 0 : i32
    return %c0_i32, %c0_i32_0 : i32, i32
  }
  func.func @transform_3(%arg0: i32) -> (i32, i32) {
    %c0_i32 = arith.constant 0 : i32
    %c0_i32_0 = arith.constant 0 : i32
    %c0_i32_1 = arith.constant 0 : i32
    return %c0_i32, %c0_i32_0 : i32, i32
  }
  func.func @transform_4(%arg0: i32) -> (i32, i32) {
    %c0_i32 = arith.constant 0 : i32
    %c0_i32_0 = arith.constant 0 : i32
    %c0_i32_1 = arith.constant 0 : i32
    return %c0_i32, %c0_i32_0 : i32, i32
  }
  func.func @transform_5(%arg0: i32) -> (i32, i32) {
    %c0_i32 = arith.constant 0 : i32
    %c0_i32_0 = arith.constant 0 : i32
    %c0_i32_1 = arith.constant 0 : i32
    return %c0_i32, %c0_i32_0 : i32, i32
  }
  func.func @transform_6(%arg0: i32) -> (i32, i32) {
    %c0_i32 = arith.constant 0 : i32
    %c0_i32_0 = arith.constant 0 : i32
    %c0_i32_1 = arith.constant 0 : i32
    return %c0_i32, %c0_i32_0 : i32, i32
  }
  func.func @transform_7(%arg0: i32) -> (i32, i32) {
    %c0_i32 = arith.constant 0 : i32
    %c0_i32_0 = arith.constant 0 : i32
    return %arg0, %c0_i32 : i32, i32
  }
}

</mosaic_0001>

<bundles_post_ra>
// kernel: predictor_forward.1
= control target key start
LH: loop header
LB: loop body
LE: loop exit
PB: predicated region body
PF: predicated region fallthrough
CT: control target
= control target key end

     0   :  { %s1854_s24 = smov 0   ;;  %s2520_s0 = inlined_call_operand.vmem [shape: f32[256,640], index: 0, kind: input, shape index: {}]   ;;  %s2521_s1 = inlined_call_operand.vmem [shape: f32[640,128], index: 1, kind: input, shape index: {}]   ;;  %s2522_s2 = inlined_call_operand.vmem [shape: f32[1,128], index: 2, kind: input, shape index: {}]   ;;  %s2523_s3 = inlined_call_operand.vmem [shape: f32[128,128], index: 3, kind: input, shape index: {}]   ;;  %s2524_s4 = inlined_call_operand.vmem [shape: f32[1,128], index: 4, kind: input, shape index: {}]   ;;  %s2525_s5 = inlined_call_operand.vmem [shape: f32[128,128], index: 5, kind: input, shape index: {}]   ;;  %s2526_s6 = inlined_call_operand.vmem [shape: f32[1,128], index: 6, kind: input, shape index: {}]   ;;  %s2527_s7 = inlined_call_operand.vmem [shape: f32[256,128], index: 7, kind: output, shape index: {}]  }
   0x1 LB: > { %s1327_s25 = sadd.s32 4294967295, %s1812_s24   ;;  %p1331_p0 = scmp.ge.s32.totalorder %s1812_s24, 1  ;;  %s1812_s24 = sphi %s1854_s24, %s17_s24  }
   0x2   : > { %p239_p1 = scmp.lt.s32.totalorder %s1812_s24, 3 }
   0x4   : > { %p240_p2 = pnand %p1331_p0, %p239_p1 }
   0x6   : > { %243 = sbr.rel (%p240_p2) target bundleno = 735 (0x2df), region = 48 }
   0xb   : > { %v396_v0 = vld [vmem:[%s2521_s1 + $0xf8] sm:$0xff]  ;;  %v395_v2 = vld [vmem:[%s2521_s1 + $0xf0] sm:$0xff]  ;;  %v394_v6 = vld [vmem:[%s2521_s1 + $0xe8] sm:$0xff]  ;;  %s1939_s11 = sshll.u32 %s1327_s25, 4 }
   0xc   : > { %v380_v1 = vld [vmem:[%s2521_s1 + $0x78] sm:$0xff]  ;;  %1341 = vmatprep.subr.mxu0 %v396_v0  ;;  %v379_v4 = vld [vmem:[%s2521_s1 + $0x70] sm:$0xff]  ;;  %v378_v8 = vld [vmem:[%s2521_s1 + $0x68] sm:$0xff]  ;;  %p273_p3 = scmp.lt.s32.totalorder %s1939_s11, 31 }
   0xd   : > { %v428_v3 = vld [vmem:[%s2521_s1 + $0x1f8] sm:$0xff]  ;;  %1342 = vmatpush3.msra.mxu0 %v380_v1  ;;  %v427_v7 = vld [vmem:[%s2521_s1 + $0x1f0] sm:$0xff]  ;;  %v426_v10 = vld [vmem:[%s2521_s1 + $0x1e8] sm:$0xff] }
   0xe   : > { %v412_v5 = vld [vmem:[%s2521_s1 + $0x178] sm:$0xff]  ;;  %1421 = vmatprep.subr.mxu1 %v428_v3  ;;  %1343 = vmatprep.subr.mxu0 %v395_v2  ;;  %v411_v9 = vld [vmem:[%s2521_s1 + $0x170] sm:$0xff]  ;;  %v393_v11 = vld [vmem:[%s2521_s1 + $0xe0] sm:$0xff]  ;;  %s2579_s11 = smov (!%p273_p3, %s1939_s11), 31 }
   0xf   : > { %1422 = vmatpush3.msra.mxu1 %v412_v5  ;;  %1344 = vmatpush3.msra.mxu0 %v379_v4  ;;  %v410_v12 = vld [vmem:[%s2521_s1 + $0x168] sm:$0xff]  ;;  %v377_v13 = vld [vmem:[%s2521_s1 + $0x60] sm:$0xff]  ;;  %v392_v15 = vld [vmem:[%s2521_s1 + $0xd8] sm:$0xff]  ;;  %s1797_s14 = smul.u32 40, %s2579_s11  ;;  %s1335_s29 = sshll.u32 %s2579_s11, 3 }
  0x10   : > { %1423 = vmatprep.subr.mxu1 %v427_v7  ;;  %1345 = vmatprep.subr.mxu0 %v394_v6  ;;  %v425_v14 = vld [vmem:[%s2521_s1 + $0x1e0] sm:$0xff]  ;;  %v376_v17 = vld [vmem:[%s2521_s1 + $0x58] sm:$0xff]  ;;  %v391_v19 = vld [vmem:[%s2521_s1 + $0xd0] sm:$0xff]  ;;  %s2499_s13 = scalar_lea.vmem %s2527_s7, %s1335_s29 }
  0x11   : > { %1424 = vmatpush3.msra.mxu1 %v411_v9  ;;  %1346 = vmatpush3.msra.mxu0 %v378_v8  ;;  %v409_v16 = vld [vmem:[%s2521_s1 + $0x160] sm:$0xff]  ;;  %v424_v18 = vld [vmem:[%s2521_s1 + $0x1d8] sm:$0xff]  ;;  %v375_v21 = vld [vmem:[%s2521_s1 + $0x50] sm:$0xff]  ;;  %s2041_s12 = scalar_lea.vmem %s2520_s0, %s1797_s14 }
  0x12   : > { %1425 = vmatprep.subr.mxu1 %v426_v10  ;;  %1347 = vmatprep.subr.mxu0 %v393_v11  ;;  %v408_v20 = vld [vmem:[%s2521_s1 + $0x158] sm:$0xff]  ;;  %v423_v22 = vld [vmem:[%s2521_s1 + $0x1d0] sm:$0xff]  ;;  %v390_v23 = vld [vmem:[%s2521_s1 + $0xc8] sm:$0xff] }
  0x13   : > { %1426 = vmatpush3.msra.mxu1 %v410_v12  ;;  %1348 = vmatpush3.msra.mxu0 %v377_v13  ;;  %v407_v24 = vld [vmem:[%s2521_s1 + $0x150] sm:$0xff]  ;;  %v374_v25 = vld [vmem:[%s2521_s1 + $0x48] sm:$0xff]  ;;  %v389_v27 = vld [vmem:[%s2521_s1 + $0xc0] sm:$0xff] }
  0x14   : > { %1427 = vmatprep.subr.mxu1 %v425_v14  ;;  %1349 = vmatprep.subr.mxu0 %v392_v15  ;;  %v422_v26 = vld [vmem:[%s2521_s1 + $0x1c8] sm:$0xff]  ;;  %v373_v29 = vld [vmem:[%s2521_s1 + $0x40] sm:$0xff]  ;;  %v388_v31 = vld [vmem:[%s2521_s1 + $0xb8] sm:$0xff] }
  0x15   : > { %1428 = vmatpush3.msra.mxu1 %v409_v16  ;;  %1350 = vmatpush3.msra.mxu0 %v376_v17  ;;  %v406_v28 = vld [vmem:[%s2521_s1 + $0x148] sm:$0xff]  ;;  %v421_v30 = vld [vmem:[%s2521_s1 + $0x1c0] sm:$0xff]  ;;  %v372_v33 = vld [vmem:[%s2521_s1 + $0x38] sm:$0xff] }
  0x16   : > { %1429 = vmatprep.subr.mxu1 %v424_v18  ;;  %1351 = vmatprep.subr.mxu0 %v391_v19  ;;  %v405_v32 = vld [vmem:[%s2521_s1 + $0x140] sm:$0xff]  ;;  %v420_v34 = vld [vmem:[%s2521_s1 + $0x1b8] sm:$0xff]  ;;  %v387_v35 = vld [vmem:[%s2521_s1 + $0xb0] sm:$0xff] }
  0x17   : > { %1430 = vmatpush3.msra.mxu1 %v408_v20  ;;  %1352 = vmatpush3.msra.mxu0 %v375_v21  ;;  %v404_v36 = vld [vmem:[%s2521_s1 + $0x138] sm:$0xff]  ;;  %v371_v37 = vld [vmem:[%s2521_s1 + $0x30] sm:$0xff]  ;;  %v386_v39 = vld [vmem:[%s2521_s1 + $0xa8] sm:$0xff] }
  0x18   : > { %1431 = vmatprep.subr.mxu1 %v423_v22  ;;  %1353 = vmatprep.subr.mxu0 %v390_v23  ;;  %v419_v38 = vld [vmem:[%s2521_s1 + $0x1b0] sm:$0xff]  ;;  %v370_v41 = vld [vmem:[%s2521_s1 + $0x28] sm:$0xff]  ;;  %v385_v43 = vld [vmem:[%s2521_s1 + $0xa0] sm:$0xff] }
  0x19   : > { %1432 = vmatpush3.msra.mxu1 %v407_v24  ;;  %1354 = vmatpush3.msra.mxu0 %v374_v25  ;;  %v403_v40 = vld [vmem:[%s2521_s1 + $0x130] sm:$0xff]  ;;  %v418_v42 = vld [vmem:[%s2521_s1 + $0x1a8] sm:$0xff]  ;;  %v369_v45 = vld [vmem:[%s2521_s1 + $0x20] sm:$0xff] }
  0x1a   : > { %1433 = vmatprep.subr.mxu1 %v422_v26  ;;  %1355 = vmatprep.subr.mxu0 %v389_v27  ;;  %v402_v44 = vld [vmem:[%s2521_s1 + $0x128] sm:$0xff]  ;;  %v417_v46 = vld [vmem:[%s2521_s1 + $0x1a0] sm:$0xff]  ;;  %v384_v47 = vld [vmem:[%s2521_s1 + $0x98] sm:$0xff] }
  0x1b   : > { %1434 = vmatpush3.msra.mxu1 %v406_v28  ;;  %1356 = vmatpush3.msra.mxu0 %v373_v29  ;;  %v401_v48 = vld [vmem:[%s2521_s1 + $0x120] sm:$0xff]  ;;  %v368_v49 = vld [vmem:[%s2521_s1 + $0x18] sm:$0xff]  ;;  %v383_v51 = vld [vmem:[%s2521_s1 + $0x90] sm:$0xff] }
  0x1c   : > { %1435 = vmatprep.subr.mxu1 %v421_v30  ;;  %1357 = vmatprep.subr.mxu0 %v388_v31  ;;  %v416_v50 = vld [vmem:[%s2521_s1 + $0x198] sm:$0xff]  ;;  %v367_v53 = vld [vmem:[%s2521_s1 + $0x10] sm:$0xff]  ;;  %v382_v55 = vld [vmem:[%s2521_s1 + $0x88] sm:$0xff] }
  0x1d   : > { %1436 = vmatpush3.msra.mxu1 %v405_v32  ;;  %1358 = vmatpush3.msra.mxu0 %v372_v33  ;;  %v400_v52 = vld [vmem:[%s2521_s1 + $0x118] sm:$0xff]  ;;  %v415_v54 = vld [vmem:[%s2521_s1 + $0x190] sm:$0xff]  ;;  %v366_v57 = vld [vmem:[%s2521_s1 + $0x8] sm:$0xff] }
  0x1e   : > { %1437 = vmatprep.subr.mxu1 %v420_v34  ;;  %1359 = vmatprep.subr.mxu0 %v387_v35  ;;  %v399_v56 = vld [vmem:[%s2521_s1 + $0x110] sm:$0xff]  ;;  %v414_v58 = vld [vmem:[%s2521_s1 + $0x188] sm:$0xff]  ;;  %v381_v59 = vld [vmem:[%s2521_s1 + $0x80] sm:$0xff] }
  0x1f   : > { %1438 = vmatpush3.msra.mxu1 %v404_v36  ;;  %1360 = vmatpush3.msra.mxu0 %v371_v37  ;;  %v286_v60 = vld [vmem:[%s2041_s12 + $0x8] sm:$0xff]  ;;  %v365_v61 = vld [vmem:[%s2521_s1] sm:$0xff]  ;;  %v444_v1 = vld [vmem:[%s2521_s1 + $0x278] sm:$0xff] }
  0x20   : > { %1439 = vmatprep.subr.mxu1 %v419_v38  ;;  %1361 = vmatprep.subr.mxu0 %v386_v39  ;;  %v398_v62 = vld [vmem:[%s2521_s1 + $0x108] sm:$0xff]  ;;  %v285_v63 = vld [vmem:[%s2041_s12] sm:$0xff]  ;;  %v288_v3 = vld [vmem:[%s2041_s12 + $0x18] sm:$0xff] }
  0x21   : > { %1440 = vmatpush3.msra.mxu1 %v403_v40  ;;  %1362 = vmatpush3.msra.mxu0 %v370_v41  ;;  %v413_v0 = vld [vmem:[%s2521_s1 + $0x180] sm:$0xff]  ;;  %v287_v4 = vld [vmem:[%s2041_s12 + $0x10] sm:$0xff]  ;;  %v290_v6 = vld [vmem:[%s2041_s12 + $0x28] sm:$0xff] }
  0x22   : > { %1441 = vmatprep.subr.mxu1 %v418_v42  ;;  %1363 = vmatprep.subr.mxu0 %v385_v43  ;;  %v397_v2 = vld [vmem:[%s2521_s1 + $0x100] sm:$0xff]  ;;  %v291_v5 = vld [vmem:[%s2041_s12 + $0x30] sm:$0xff]  ;;  %v296_v9 = vld [vmem:[%s2041_s12 + $0x58] sm:$0xff] }
  0x23   : > { %1442 = vmatpush3.msra.mxu1 %v402_v44  ;;  %1364 = vmatpush3.msra.mxu0 %v369_v45  ;;  %v443_v7 = vld [vmem:[%s2521_s1 + $0x270] sm:$0xff]  ;;  %v293_v8 = vld [vmem:[%s2041_s12 + $0x40] sm:$0xff]  ;;  %v442_v10 = vld [vmem:[%s2521_s1 + $0x268] sm:$0xff] }
  0x24   : > { %1443 = vmatprep.subr.mxu1 %v417_v46  ;;  %1365 = vmatprep.subr.mxu0 %v384_v47  ;;  %v292_v11 = vld [vmem:[%s2041_s12 + $0x38] sm:$0xff]  ;;  %v295_v12 = vld [vmem:[%s2041_s12 + $0x50] sm:$0xff]  ;;  %v298_v13 = vld [vmem:[%s2041_s12 + $0x68] sm:$0xff] }
  0x25   : > { %1444 = vmatpush3.msra.mxu1 %v401_v48  ;;  %1366 = vmatpush3.msra.mxu0 %v368_v49  ;;  %v301_v14 = vld [vmem:[%s2041_s12 + $0x80] sm:$0xff]  ;;  %v440_v17 = vld [vmem:[%s2521_s1 + $0x258] sm:$0xff]  ;;  %v303_v19 = vld [vmem:[%s2041_s12 + $0x90] sm:$0xff] }
  0x26   : > { %1445 = vmatprep.subr.mxu1 %v416_v50  ;;  %1367 = vmatprep.subr.mxu0 %v383_v51  ;;  %v441_v15 = vld [vmem:[%s2521_s1 + $0x260] sm:$0xff]  ;;  %v300_v18 = vld [vmem:[%s2041_s12 + $0x78] sm:$0xff]  ;;  %v306_v20 = vld [vmem:[%s2041_s12 + $0xa8] sm:$0xff] }
  0x27   : > { %1446 = vmatpush3.msra.mxu1 %v400_v52  ;;  %1368 = vmatpush3.msra.mxu0 %v367_v53  ;;  %v297_v16 = vld [vmem:[%s2041_s12 + $0x60] sm:$0xff]  ;;  %v439_v21 = vld [vmem:[%s2521_s1 + $0x250] sm:$0xff]  ;;  %v302_v22 = vld [vmem:[%s2041_s12 + $0x88] sm:$0xff] }
  0x28   : > { %1447 = vmatprep.subr.mxu1 %v415_v54  ;;  %1369 = vmatprep.subr.mxu0 %v382_v55  ;;  %v305_v23 = vld [vmem:[%s2041_s12 + $0xa0] sm:$0xff]  ;;  %v308_v24 = vld [vmem:[%s2041_s12 + $0xb8] sm:$0xff]  ;;  %v311_v25 = vld [vmem:[%s2041_s12 + $0xd0] sm:$0xff] }
  0x29   : > { %1448 = vmatpush3.msra.mxu1 %v399_v56  ;;  %1370 = vmatpush3.msra.mxu0 %v366_v57  ;;  %v438_v26 = vld [vmem:[%s2521_s1 + $0x248] sm:$0xff]  ;;  %v307_v27 = vld [vmem:[%s2041_s12 + $0xb0] sm:$0xff]  ;;  %v437_v28 = vld [vmem:[%s2521_s1 + $0x240] sm:$0xff] }
  0x2a   : > { %1449 = vmatprep.subr.mxu1 %v414_v58  ;;  %1371 = vmatprep.subr.mxu0 %v381_v59  ;;  %v310_v29 = vld [vmem:[%s2041_s12 + $0xc8] sm:$0xff]  ;;  %v313_v30 = vld [vmem:[%s2041_s12 + $0xe0] sm:$0xff]  ;;  %v316_v31 = vld [vmem:[%s2041_s12 + $0xf8] sm:$0xff] }
  0x2b   : > { %516 = vmatprep.mubr.f32.mxu0 %v286_v60  ;;  %1372 = vmatpush3.msra.mxu0 %v365_v61  ;;  %v436_v32 = vld [vmem:[%s2521_s1 + $0x238] sm:$0xff]  ;;  %v315_v34 = vld [vmem:[%s2041_s12 + $0xf0] sm:$0xff]  ;;  %v318_v35 = vld [vmem:[%s2041_s12 + $0x108] sm:$0xff] }
  0x2c   : > { %1450 = vmatpush3.msra.mxu1 %v398_v62  ;;  %517 = vmatmul.mubr.f32.vlgmr.msra.gmra.mxu0 %v285_v63  ;;  %v312_v33 = vld [vmem:[%s2041_s12 + $0xd8] sm:$0xff]  ;;  %v321_v36 = vld [vmem:[%s2041_s12 + $0x120] sm:$0xff]  ;;  %v435_v37 = vld [vmem:[%s2521_s1 + $0x230] sm:$0xff] }
  0x2d   : > { %1451 = vmatprep.subr.mxu1 %v413_v0  ;;  %1597 = vmatprep.subr.mxu0 %v444_v1  ;;  %v317_v38 = vld [vmem:[%s2041_s12 + $0x100] sm:$0xff]  ;;  %v434_v39 = vld [vmem:[%s2521_s1 + $0x228] sm:$0xff]  ;;  %v320_v40 = vld [vmem:[%s2041_s12 + $0x118] sm:$0xff] }
  0x2e   : > { %1452 = vmatpush3.msra.mxu1 %v397_v2  ;;  %661 = vmatprep.mubr.f32.mxu1 %v288_v3  ;;  %v323_v41 = vld [vmem:[%s2041_s12 + $0x130] sm:$0xff]  ;;  %v326_v42 = vld [vmem:[%s2041_s12 + $0x148] sm:$0xff]  ;;  %v433_v43 = vld [vmem:[%s2521_s1 + $0x220] sm:$0xff] }
  0x2f   : > { %1598 = vmatpush3.msra.mxu0 %v444_v1  ;;  %662 = vmatmul.mubr.f32.vlgmr.msra.gmra.mxu1 %v287_v4  ;;  %v322_v44 = vld [vmem:[%s2041_s12 + $0x128] sm:$0xff]  ;;  %v325_v45 = vld [vmem:[%s2041_s12 + $0x140] sm:$0xff]  ;;  %v328_v46 = vld [vmem:[%s2041_s12 + $0x158] sm:$0xff] }
  0x30   : > { %521 = vmatprep.mubr.f32.mxu0 %v291_v5  ;;  %1599 = vmatprep.subr.mxu0 %v443_v7  ;;  %v331_v47 = vld [vmem:[%s2041_s12 + $0x170] sm:$0xff]  ;;  %v432_v48 = vld [vmem:[%s2521_s1 + $0x218] sm:$0xff]  ;;  %v330_v51 = vld [vmem:[%s2041_s12 + $0x168] sm:$0xff] }
  0x31   : > { %522 = vmatmul.mubr.f32.gmra.mxu0 %v290_v6  ;;  %666 = vmatprep.mubr.f32.mxu1 %v293_v8  ;;  %v327_v49 = vld [vmem:[%s2041_s12 + $0x150] sm:$0xff]  ;;  %v333_v52 = vld [vmem:[%s2041_s12 + $0x180] sm:$0xff]  ;;  %v336_v53 = vld [vmem:[%s2041_s12 + $0x198] sm:$0xff] }
  0x32   : > { %1600 = vmatpush3.msra.mxu0 %v443_v7  ;;  %526 = vmatprep.mubr.f32.mxu0 %v296_v9  ;;  %v431_v50 = vld [vmem:[%s2521_s1 + $0x210] sm:$0xff]  ;;  %v430_v54 = vld [vmem:[%s2521_s1 + $0x208] sm:$0xff]  ;;  %v332_v55 = vld [vmem:[%s2041_s12 + $0x178] sm:$0xff] }
  0x33   : > { %1601 = vmatprep.subr.mxu0 %v442_v10  ;;  %667 = vmatmul.mubr.f32.gmra.mxu1 %v292_v11  ;;  %v335_v56 = vld [vmem:[%s2041_s12 + $0x190] sm:$0xff]  ;;  %v338_v57 = vld [vmem:[%s2041_s12 + $0x1a8] sm:$0xff]  ;;  %v341_v58 = vld [vmem:[%s2041_s12 + $0x1c0] sm:$0xff] }
  0x34   : > { %1602 = vmatpush3.msra.mxu0 %v442_v10  ;;  %671 = vmatprep.mubr.f32.mxu1 %v298_v13  ;;  %v429_v59 = vld [vmem:[%s2521_s1 + $0x200] sm:$0xff]  ;;  %v340_v61 = vld [vmem:[%s2041_s12 + $0x1b8] sm:$0xff]  ;;  %v343_v62 = vld [vmem:[%s2041_s12 + $0x1d0] sm:$0xff] }
  0x35   : > { %527 = vmatmul.mubr.f32.gmra.mxu0 %v295_v12  ;;  %1603 = vmatprep.subr.mxu0 %v441_v15  ;;  %v337_v60 = vld [vmem:[%s2041_s12 + $0x1a0] sm:$0xff]  ;;  %v346_v63 = vld [vmem:[%s2041_s12 + $0x1e8] sm:$0xff]  ;;  %v348_v2 = vld [vmem:[%s2041_s12 + $0x1f8] sm:$0xff] }
  0x36   : > { %531 = vmatprep.mubr.f32.mxu0 %v301_v14  ;;  %1604 = vmatpush3.msra.mxu0 %v441_v15  ;;  %v342_v0 = vld [vmem:[%s2041_s12 + $0x1c8] sm:$0xff]  ;;  %v345_v1 = vld [vmem:[%s2041_s12 + $0x1e0] sm:$0xff]  ;;  %v351_v3 = vld [vmem:[%s2041_s12 + $0x210] sm:$0xff] }
  0x37   : > { %672 = vmatmul.mubr.f32.gmra.mxu1 %v297_v16  ;;  %1605 = vmatprep.subr.mxu0 %v440_v17  ;;  %v347_v4 = vld [vmem:[%s2041_s12 + $0x1f0] sm:$0xff]  ;;  %v350_v5 = vld [vmem:[%s2041_s12 + $0x208] sm:$0xff]  ;;  %v353_v6 = vld [vmem:[%s2041_s12 + $0x220] sm:$0xff] }
  0x38   : > { %676 = vmatprep.mubr.f32.mxu1 %v303_v19  ;;  %1606 = vmatpush3.msra.mxu0 %v440_v17  ;;  %v356_v7 = vld [vmem:[%s2041_s12 + $0x238] sm:$0xff]  ;;  %v355_v9 = vld [vmem:[%s2041_s12 + $0x230] sm:$0xff]  ;;  %v358_v10 = vld [vmem:[%s2041_s12 + $0x248] sm:$0xff] }
  0x39   : > { %532 = vmatmul.mubr.f32.gmra.mxu0 %v300_v18  ;;  %1607 = vmatprep.subr.mxu0 %v439_v21  ;;  %v352_v8 = vld [vmem:[%s2041_s12 + $0x218] sm:$0xff]  ;;  %v361_v11 = vld [vmem:[%s2041_s12 + $0x260] sm:$0xff]  ;;  %v363_v14 = vld [vmem:[%s2041_s12 + $0x270] sm:$0xff] }
  0x3a   : > { %536 = vmatprep.mubr.f32.mxu0 %v306_v20  ;;  %1608 = vmatpush3.msra.mxu0 %v439_v21  ;;  %v357_v12 = vld [vmem:[%s2041_s12 + $0x240] sm:$0xff]  ;;  %v360_v13 = vld [vmem:[%s2041_s12 + $0x258] sm:$0xff]  ;;  %v362_v16 = vld [vmem:[%s2041_s12 + $0x268] sm:$0xff] }
  0x3b   : > { %677 = vmatmul.mubr.f32.gmra.mxu1 %v302_v22  ;;  %1609 = vmatprep.subr.mxu0 %v438_v26  ;;  %v289_v15 = vld [vmem:[%s2041_s12 + $0x20] sm:$0xff]  ;;  %v294_v17 = vld [vmem:[%s2041_s12 + $0x48] sm:$0xff]  ;;  %v299_v18 = vld [vmem:[%s2041_s12 + $0x70] sm:$0xff] }
  0x3c   : > { %681 = vmatprep.mubr.f32.mxu1 %v308_v24  ;;  %1610 = vmatpush3.msra.mxu0 %v438_v26  ;;  %v304_v19 = vld [vmem:[%s2041_s12 + $0x98] sm:$0xff]  ;;  %v309_v20 = vld [vmem:[%s2041_s12 + $0xc0] sm:$0xff]  ;;  %v314_v21 = vld [vmem:[%s2041_s12 + $0xe8] sm:$0xff] }
  0x3d   : > { %537 = vmatmul.mubr.f32.gmra.mxu0 %v305_v23  ;;  %1611 = vmatprep.subr.mxu0 %v437_v28  ;;  %v319_v22 = vld [vmem:[%s2041_s12 + $0x110] sm:$0xff]  ;;  %v324_v23 = vld [vmem:[%s2041_s12 + $0x138] sm:$0xff]  ;;  %v329_v24 = vld [vmem:[%s2041_s12 + $0x160] sm:$0xff] }
  0x3e   : > { %541 = vmatprep.mubr.f32.mxu0 %v311_v25  ;;  %1612 = vmatpush3.msra.mxu0 %v437_v28  ;;  %v918_v25 = vld [vmem:[%s2523_s3 + $0x78] sm:$0xff]  ;;  %v334_v26 = vld [vmem:[%s2041_s12 + $0x188] sm:$0xff]  ;;  %v917_v28 = vld [vmem:[%s2523_s3 + $0x70] sm:$0xff] }
  0x3f   : > { %682 = vmatmul.mubr.f32.gmra.mxu1 %v307_v27  ;;  %1613 = vmatprep.subr.mxu0 %v436_v32  ;;  %v339_v27 = vld [vmem:[%s2041_s12 + $0x1b0] sm:$0xff] }
  0x40   : > { %686 = vmatprep.mubr.f32.mxu1 %v313_v30  ;;  %1614 = vmatpush3.msra.mxu0 %v436_v32  ;;  %v349_v30 = vld [vmem:[%s2041_s12 + $0x200] sm:$0xff]  ;;  %v354_v32 = vld [vmem:[%s2041_s12 + $0x228] sm:$0xff] }
  0x41   : > { %542 = vmatmul.mubr.f32.gmra.mxu0 %v310_v29  ;;  %1615 = vmatprep.subr.mxu0 %v435_v37  ;;  %v344_v29 = vld [vmem:[%s2041_s12 + $0x1d8] sm:$0xff] }
  0x42   : > { %546 = vmatprep.mubr.f32.mxu0 %v316_v31  ;;  %1616 = vmatpush3.msra.mxu0 %v435_v37  ;;  %v916_v31 = vld [vmem:[%s2523_s3 + $0x68] sm:$0xff]  ;;  %v913_v37 = vld [vmem:[%s2523_s3 + $0x50] sm:$0xff] }
  0x43   : > { %687 = vmatmul.mubr.f32.gmra.mxu1 %v312_v33  ;;  %1617 = vmatprep.subr.mxu0 %v434_v39  ;;  %v359_v33 = vld [vmem:[%s2041_s12 + $0x250] sm:$0xff] }
  0x44   : > { %691 = vmatprep.mubr.f32.mxu1 %v318_v35  ;;  %1618 = vmatpush3.msra.mxu0 %v434_v39  ;;  %v364_v35 = vld [vmem:[%s2041_s12 + $0x278] sm:$0xff]  ;;  %v911_v39 = vld [vmem:[%s2523_s3 + $0x40] sm:$0xff] }
  0x45   : > { %547 = vmatmul.mubr.f32.gmra.mxu0 %v315_v34  ;;  %1619 = vmatprep.subr.mxu0 %v433_v43  ;;  %v915_v34 = vld [vmem:[%s2523_s3 + $0x60] sm:$0xff] }
  0x46   : > { %551 = vmatprep.mubr.f32.mxu0 %v321_v36  ;;  %1620 = vmatpush3.msra.mxu0 %v433_v43  ;;  %v914_v36 = vld [vmem:[%s2523_s3 + $0x58] sm:$0xff]  ;;  %v907_v43 = vld [vmem:[%s2523_s3 + $0x20] sm:$0xff] }
  0x47   : > { %692 = vmatmul.mubr.f32.gmra.mxu1 %v317_v38  ;;  %1621 = vmatprep.subr.mxu0 %v432_v48  ;;  %v912_v38 = vld [vmem:[%s2523_s3 + $0x48] sm:$0xff] }
  0x48   : > { %696 = vmatprep.mubr.f32.mxu1 %v323_v41  ;;  %1622 = vmatpush3.msra.mxu0 %v432_v48  ;;  %v909_v41 = vld [vmem:[%s2523_s3 + $0x30] sm:$0xff]  ;;  %v2249_v48 = vld [vmem:[%s2525_s5 + $0x78] sm:$0xff] }
  0x49   : > { %552 = vmatmul.mubr.f32.gmra.mxu0 %v320_v40  ;;  %1623 = vmatprep.subr.mxu0 %v431_v50  ;;  %v910_v40 = vld [vmem:[%s2523_s3 + $0x38] sm:$0xff] }
  0x4a   : > { %556 = vmatprep.mubr.f32.mxu0 %v326_v42  ;;  %1624 = vmatpush3.msra.mxu0 %v431_v50  ;;  %v908_v42 = vld [vmem:[%s2523_s3 + $0x28] sm:$0xff] }
  0x4b   : > { %697 = vmatmul.mubr.f32.gmra.mxu1 %v322_v44  ;;  %1625 = vmatprep.subr.mxu0 %v430_v54  ;;  %v906_v44 = vld [vmem:[%s2523_s3 + $0x18] sm:$0xff]  ;;  %v2262_v50 = vld [vmem:[%s2525_s5 + $0x68] sm:$0xff] }
  0x4c   : > { %701 = vmatprep.mubr.f32.mxu1 %v328_v46  ;;  %1626 = vmatpush3.msra.mxu0 %v430_v54  ;;  %v904_v46 = vld [vmem:[%s2523_s3 + $0x8] sm:$0xff] }
  0x4d   : > { %557 = vmatmul.mubr.f32.gmra.mxu0 %v325_v45  ;;  %1627 = vmatprep.subr.mxu0 %v429_v59  ;;  %v905_v45 = vld [vmem:[%s2523_s3 + $0x10] sm:$0xff]  ;;  %v2290_v54 = vld [vmem:[%s2525_s5 + $0x48] sm:$0xff] }
  0x4e   : > { %561 = vmatprep.mubr.f32.mxu0 %v331_v47  ;;  %1628 = vmatpush3.msra.mxu0 %v429_v59  ;;  %v903_v47 = vld [vmem:[%s2523_s3] sm:$0xff]  ;;  %2546 = vst [vmem:[#allocation4_spill] sm:$0xff] %v2290_v54 }
  0x4f   : > { %702 = vmatmul.mubr.f32.gmra.mxu1 %v327_v49  ;;  %1653 = vmatprep.subr.mxu1 %v918_v25  ;;  %v2254_v49 = vld [vmem:[%s2525_s5 + $0x70] sm:$0xff]  ;;  %v2325_v59 = vld [vmem:[%s2525_s5 + $0x20] sm:$0xff] }
  0x50   : > { %706 = vmatprep.mubr.f32.mxu1 %v333_v52  ;;  %1654 = vmatpush3.msra.mxu1 %v918_v25  ;;  %v2276_v52 = vld [vmem:[%s2525_s5 + $0x58] sm:$0xff]  ;;  %2551 = vst [vmem:[#allocation9_spill] sm:$0xff] %v2325_v59 }
  0x51   : > { %562 = vmatmul.mubr.f32.gmra.mxu0 %v330_v51  ;;  %1655 = vmatprep.subr.mxu1 %v917_v28  ;;  %v2269_v51 = vld [vmem:[%s2525_s5 + $0x60] sm:$0xff]  ;;  %2544 = vst [vmem:[#allocation2_spill] sm:$0xff] %v2276_v52 }
  0x52   : > { %566 = vmatprep.mubr.f32.mxu0 %v336_v53  ;;  %1656 = vmatpush3.msra.mxu1 %v917_v28  ;;  %v2283_v53 = vld [vmem:[%s2525_s5 + $0x50] sm:$0xff] }
  0x53   : > { %707 = vmatmul.mubr.f32.gmra.mxu1 %v332_v55  ;;  %1657 = vmatprep.subr.mxu1 %v916_v31  ;;  %2545 = vst [vmem:[#allocation3_spill] sm:$0xff] %v2283_v53  ;;  %v2297_v55 = vld [vmem:[%s2525_s5 + $0x40] sm:$0xff] }
  0x54   : > { %711 = vmatprep.mubr.f32.mxu1 %v338_v57  ;;  %1658 = vmatpush3.msra.mxu1 %v916_v31  ;;  %2547 = vst [vmem:[#allocation5_spill] sm:$0xff] %v2297_v55  ;;  %v2311_v57 = vld [vmem:[%s2525_s5 + $0x30] sm:$0xff] }
  0x55   : > { %567 = vmatmul.mubr.f32.gmra.mxu0 %v335_v56  ;;  %1659 = vmatprep.subr.mxu1 %v915_v34  ;;  %v2304_v56 = vld [vmem:[%s2525_s5 + $0x38] sm:$0xff]  ;;  %2549 = vst [vmem:[#allocation7_spill] sm:$0xff] %v2311_v57 }
  0x56   : > { %571 = vmatprep.mubr.f32.mxu0 %v341_v58  ;;  %1660 = vmatpush3.msra.mxu1 %v915_v34  ;;  %2548 = vst [vmem:[#allocation6_spill] sm:$0xff] %v2304_v56  ;;  %v2318_v58 = vld [vmem:[%s2525_s5 + $0x28] sm:$0xff] }
  0x57   : > { %712 = vmatmul.mubr.f32.gmra.mxu1 %v337_v60  ;;  %1661 = vmatprep.subr.mxu1 %v914_v36  ;;  %2550 = vst [vmem:[#allocation8_spill] sm:$0xff] %v2318_v58 }
  0x58   : > { %716 = vmatprep.mubr.f32.mxu1 %v343_v62  ;;  %1662 = vmatpush3.msra.mxu1 %v914_v36 }
  0x59   : > { %572 = vmatmul.mubr.f32.gmra.mxu0 %v340_v61  ;;  %1663 = vmatprep.subr.mxu1 %v913_v37 }
  0x5a   : > { %576 = vmatprep.mubr.f32.mxu0 %v346_v63  ;;  %1664 = vmatpush3.msra.mxu1 %v913_v37 }
  0x5b   : > { %717 = vmatmul.mubr.f32.gmra.mxu1 %v342_v0  ;;  %1665 = vmatprep.subr.mxu1 %v912_v38 }
  0x5c   : > { %721 = vmatprep.mubr.f32.mxu1 %v348_v2  ;;  %1666 = vmatpush3.msra.mxu1 %v912_v38 }
  0x5d   : > { %577 = vmatmul.mubr.f32.gmra.mxu0 %v345_v1  ;;  %1667 = vmatprep.subr.mxu1 %v911_v39 }
  0x5e   : > { %581 = vmatprep.mubr.f32.mxu0 %v351_v3  ;;  %1668 = vmatpush3.msra.mxu1 %v911_v39 }
  0x5f   : > { %722 = vmatmul.mubr.f32.gmra.mxu1 %v347_v4  ;;  %1669 = vmatprep.subr.mxu1 %v910_v40 }
  0x60   : > { %726 = vmatprep.mubr.f32.mxu1 %v353_v6  ;;  %1670 = vmatpush3.msra.mxu1 %v910_v40 }
  0x61   : > { %582 = vmatmul.mubr.f32.gmra.mxu0 %v350_v5  ;;  %1671 = vmatprep.subr.mxu1 %v909_v41 }
  0x62   : > { %586 = vmatprep.mubr.f32.mxu0 %v356_v7  ;;  %1672 = vmatpush3.msra.mxu1 %v909_v41 }
  0x63   : > { %727 = vmatmul.mubr.f32.gmra.mxu1 %v352_v8  ;;  %1673 = vmatprep.subr.mxu1 %v908_v42 }
  0x64   : > { %731 = vmatprep.mubr.f32.mxu1 %v358_v10  ;;  %1674 = vmatpush3.msra.mxu1 %v908_v42 }
  0x65   : > { %587 = vmatmul.mubr.f32.gmra.mxu0 %v355_v9  ;;  %1675 = vmatprep.subr.mxu1 %v907_v43 }
  0x66   : > { %591 = vmatprep.mubr.f32.mxu0 %v361_v11  ;;  %1676 = vmatpush3.msra.mxu1 %v907_v43 }
  0x67   : > { %732 = vmatmul.mubr.f32.gmra.mxu1 %v357_v12  ;;  %1677 = vmatprep.subr.mxu1 %v906_v44 }
  0x68   : > { %736 = vmatprep.mubr.f32.mxu1 %v363_v14  ;;  %1678 = vmatpush3.msra.mxu1 %v906_v44 }
  0x69   : > { %592 = vmatmul.mubr.f32.gmra.mxu0 %v360_v13  ;;  %1679 = vmatprep.subr.mxu1 %v905_v45 }
  0x6a   : > { %1629 = vmatprep.mubr.f32.mxu0 %v289_v15  ;;  %1680 = vmatpush3.msra.mxu1 %v905_v45 }
  0x6b   : > { %737 = vmatmul.mubr.f32.gmra.mxu1 %v362_v16  ;;  %1681 = vmatprep.subr.mxu1 %v904_v46 }
  0x6c   : > { %1682 = vmatpush3.msra.mxu1 %v904_v46  ;;  %1709 = vmatprep.subr.mxu0 %v2249_v48 }
  0x6d   : > { %1630 = vmatmul.mubr.f32.vlgmr.msra.gmra.mxu0 %v294_v17  ;;  %1683 = vmatprep.subr.mxu1 %v903_v47 }
  0x6e   : > { %1632 = vmatprep.mubr.f32.mxu0 %v299_v18  ;;  %1684 = vmatpush3.msra.mxu1 %v903_v47 }
  0x6f   : > { %1765 = vmatprep.subr.mxu1 %v2249_v48  ;;  %1710 = vmatpush3.msra.mxu0 %v2249_v48 }
  0x70   : > { %1711 = vmatprep.subr.mxu0 %v2254_v49 }
  0x71   : > { %1633 = vmatmul.mubr.f32.gmra.mxu0 %v304_v19 }
  0x72   : > { %1635 = vmatprep.mubr.f32.mxu0 %v309_v20  ;;  %1712 = vmatpush3.msra.mxu0 %v2254_v49 }
  0x73   : > { %1713 = vmatprep.subr.mxu0 %v2262_v50 }
  0x74   : > { %1714 = vmatpush3.msra.mxu0 %v2262_v50 }
  0x75   : > { %1636 = vmatmul.mubr.f32.gmra.mxu0 %v314_v21  ;;  %1715 = vmatprep.subr.mxu0 %v2269_v51 }
  0x76   : > { %1638 = vmatprep.mubr.f32.mxu0 %v319_v22  ;;  %1716 = vmatpush3.msra.mxu0 %v2269_v51 }
  0x77   : > { %1717 = vmatprep.subr.mxu0 %v2276_v52 }
  0x78   : > { %1718 = vmatpush3.msra.mxu0 %v2276_v52 }
  0x79   : > { %1639 = vmatmul.mubr.f32.gmra.mxu0 %v324_v23  ;;  %1719 = vmatprep.subr.mxu0 %v2283_v53 }
  0x7a   : > { %1641 = vmatprep.mubr.f32.mxu0 %v329_v24  ;;  %1720 = vmatpush3.msra.mxu0 %v2283_v53 }
  0x7b   : > { %1721 = vmatprep.subr.mxu0 %v2290_v54 }
  0x7c   : > { %1722 = vmatpush3.msra.mxu0 %v2290_v54 }
  0x7d   : > { %1642 = vmatmul.mubr.f32.gmra.mxu0 %v334_v26  ;;  %1723 = vmatprep.subr.mxu0 %v2297_v55 }
  0x7e   : > { %1644 = vmatprep.mubr.f32.mxu0 %v339_v27  ;;  %1724 = vmatpush3.msra.mxu0 %v2297_v55  ;;  %v2388_v55 = vld [vmem:[%s2522_s2] ss:$0 sm:$0xff] }
  0x7f   : > { %1725 = vmatprep.subr.mxu0 %v2304_v56 }
  0x80   : > { %1726 = vmatpush3.msra.mxu0 %v2304_v56 }
  0x81   : > { %1645 = vmatmul.mubr.f32.gmra.mxu0 %v344_v29  ;;  %1727 = vmatprep.subr.mxu0 %v2311_v57 }
  0x82   : > { %1647 = vmatprep.mubr.f32.mxu0 %v349_v30  ;;  %1728 = vmatpush3.msra.mxu0 %v2311_v57 }
  0x83   : > { %1729 = vmatprep.subr.mxu0 %v2318_v58 }
  0x84   : > { %1730 = vmatpush3.msra.mxu0 %v2318_v58 }
  0x85   : > { %1648 = vmatmul.mubr.f32.gmra.mxu0 %v354_v32  ;;  %1731 = vmatprep.subr.mxu0 %v2325_v59 }
  0x86   : > { %1650 = vmatprep.mubr.f32.mxu0 %v359_v33  ;;  %1732 = vmatpush3.msra.mxu0 %v2325_v59 }
  0x89   : > { %1651 = vmatmul.mubr.f32.gmra.mxu0 %v364_v35 }
  0xec   : > { %v1373_v60 = vpop.f32.mrf.mxu0 }
  0xee   : > { %v1374_v61 = vpop.f32.mrf.mxu0 }
  0xef   : > { %v1453_v62 = vpop.f32.mrf.mxu1  ;;  %v1375_v57 = vadd.f32 %v1374_v61, %v1373_v60 }
  0xf1   : > { %v1376_v63 = vpop.f32.mrf.mxu0  ;;  %v1454_v0 = vpop.f32.mrf.mxu1 }
  0xf3   : > { %v1377_v1 = vpop.f32.mrf.mxu0  ;;  %v1456_v2 = vpop.f32.mrf.mxu1 }
  0xf4   : > { %v1378_v59 = vadd.f32 %v1377_v1, %v1376_v63  ;;  %v519_v63 = vadd.f32 %v1375_v57, %v2388_v55  ;;  %v1455_v1 = vadd.f32 %v1454_v0, %v1453_v62 }
  0xf5   : > { %v1379_v3 = vpop.f32.mrf.mxu0  ;;  %v1457_v4 = vpop.f32.mrf.mxu1 }
  0xf6   : > { %v524_v53 = vadd.f32 %v1378_v59, %v2388_v55  ;;  %v664_v57 = vadd.f32 %v1455_v1, %v519_v63 }
  0xf7   : > { %v1380_v5 = vpop.f32.mrf.mxu0  ;;  %v2331_v6 = vpop.f32.mrf.mxu1 }
  0xf9   : > { %v1382_v7 = vpop.f32.mrf.mxu0  ;;  %v1460_v8 = vpop.f32.mrf.mxu1 }
  0xfb   : > { %v1383_v9 = vpop.f32.mrf.mxu0  ;;  %v1462_v10 = vpop.f32.mrf.mxu1 }
  0xfd   : > { %v1385_v11 = vpop.f32.mrf.mxu0  ;;  %v1463_v12 = vpop.f32.mrf.mxu1 }
  0xff   : > { %v1386_v13 = vpop.f32.mrf.mxu0  ;;  %v1465_v14 = vpop.f32.mrf.mxu1 }
 0x101   : > { %v1388_v15 = vpop.f32.mrf.mxu0  ;;  %v1466_v16 = vpop.f32.mrf.mxu1 }
 0x103   : > { %v1389_v17 = vpop.f32.mrf.mxu0  ;;  %v1468_v18 = vpop.f32.mrf.mxu1 }
 0x105   : > { %v2333_v19 = vpop.f32.mrf.mxu0  ;;  %v1469_v20 = vpop.f32.mrf.mxu1 }
 0x107   : > { %v1392_v21 = vpop.f32.mrf.mxu0  ;;  %v2335_v22 = vpop.f32.mrf.mxu1 }
 0x109   : > { %v1394_v23 = vpop.f32.mrf.mxu0  ;;  %v2337_v24 = vpop.f32.mrf.mxu1 }
 0x10b   : > { %v1395_v25 = vpop.f32.mrf.mxu0  ;;  %v2339_v26 = vpop.f32.mrf.mxu1 }
 0x10d   : > { %v2341_v27 = vpop.f32.mrf.mxu0  ;;  %v2343_v28 = vpop.f32.mrf.mxu1 }
 0x10f   : > { %v2345_v29 = vpop.f32.mrf.mxu0  ;;  %v2347_v30 = vpop.f32.mrf.mxu1 }
 0x111   : > { %v2349_v31 = vpop.f32.mrf.mxu0  ;;  %v2351_v32 = vpop.f32.mrf.mxu1 }
 0x113   : > { %v1401_v33 = vpop.f32.mrf.mxu0  ;;  %v2353_v34 = vpop.f32.mrf.mxu1 }
 0x115   : > { %v2355_v35 = vpop.f32.mrf.mxu0  ;;  %v2357_v36 = vpop.f32.mrf.mxu1 }
 0x117   : > { %v2359_v37 = vpop.f32.mrf.mxu0  ;;  %v2361_v38 = vpop.f32.mrf.mxu1 }
 0x119   : > { %v2363_v39 = vpop.f32.mrf.mxu0  ;;  %v2365_v40 = vpop.f32.mrf.mxu1 }
 0x11b   : > { %v2367_v41 = vpop.f32.mrf.mxu0  ;;  %v2371_v43 = vpop.f32.mrf.mxu1 }
 0x11c   : > { %2553 = vst [vmem:[#allocation11_spill] sm:$0xff] %v2371_v43 }
 0x11d   : > { %v2369_v42 = vpop.f32.mrf.mxu0  ;;  %v2377_v46 = vpop.f32.mrf.mxu1 }
 0x11e   : > { %2552 = vst [vmem:[#allocation10_spill] sm:$0xff] %v2369_v42  ;;  %2556 = vst [vmem:[#allocation14_spill] sm:$0xff] %v2377_v46  ;;  %v1384_v42 = vadd.f32 %v1383_v9, %v1382_v7  ;;  %v1390_v46 = vadd.f32 %v1389_v17, %v1388_v15 }
 0x11f   : > { %v2373_v44 = vpop.f32.mrf.mxu0  ;;  %v2383_v56 = vpop.f32.mrf.mxu1 }
 0x120   : > { %2554 = vst [vmem:[#allocation12_spill] sm:$0xff] %v2373_v44  ;;  %2559 = vst [vmem:[#allocation17_spill] sm:$0xff] %v2383_v56  ;;  %v1458_v44 = vadd.f32 %v1457_v4, %v1456_v2  ;;  %v1387_v56 = vadd.f32 %v1386_v13, %v1385_v11  ;;  %v1461_v2 = vadd.f32 %v1460_v8, %v2331_v6 }
 0x121   : > { %v2375_v45 = vpop.f32.mrf.mxu0  ;;  %v2396_v60 = vpop.f32.mrf.mxu1  ;;  %v544_v9 = vadd.f32 %v1390_v46, %v2388_v55  ;;  %v1470_v11 = vadd.f32 %v1469_v20, %v1468_v18  ;;  %v1393_v13 = vadd.f32 %v1392_v21, %v2333_v19  ;;  %v1402_v18 = vadd.f32 %v1401_v33, %v2349_v31 }
 0x122   : > { %2555 = vst [vmem:[#allocation13_spill] sm:$0xff] %v2375_v45  ;;  %v1464_v45 = vadd.f32 %v1463_v12, %v1462_v10  ;;  %v1396_v10 = vadd.f32 %v1395_v25, %v1394_v23  ;;  %v1473_v21 = vadd.f32 %v2337_v24, %v2335_v22  ;;  %v1399_v25 = vadd.f32 %v2345_v29, %v2341_v27 }
 0x123   : > { %v2379_v47 = vpop.f32.mrf.mxu0  ;;  %v2403_v4 = vpop.f32.mrf.mxu1  ;;  %v689_v20 = vadd.f32 %v1470_v11, %v544_v9  ;;  %v549_v19 = vadd.f32 %v1393_v13, %v2388_v55  ;;  %v564_v24 = vadd.f32 %v1402_v18, %v2388_v55 }
 0x124   : > { %2557 = vst [vmem:[#allocation15_spill] sm:$0xff] %v2379_v47  ;;  %v534_v47 = vadd.f32 %v1384_v42, %v2388_v55 }
 0x125   : > { %v2381_v58 = vpop.f32.mrf.mxu0  ;;  %v694_v46 = vadd.f32 %v1473_v21, %v549_v19 }
 0x126   : > { %2558 = vst [vmem:[#allocation16_spill] sm:$0xff] %v2381_v58  ;;  %v1381_v58 = vadd.f32 %v1380_v5, %v1379_v3  ;;  %v539_v3 = vadd.f32 %v1387_v56, %v2388_v55  ;;  %v1467_v5 = vadd.f32 %v1466_v16, %v1465_v14  ;;  %v679_v12 = vadd.f32 %v1464_v45, %v534_v47 }
 0x127   : > { %v2390_v54 = vpop.f32.mrf.mxu0  ;;  %v554_v14 = vadd.f32 %v1396_v10, %v2388_v55  ;;  %v1476_v16 = vadd.f32 %v2343_v28, %v2339_v26  ;;  %v1405_v26 = vadd.f32 %v2359_v37, %v2355_v35  ;;  %v1408_v45 = vadd.f32 %v2367_v41, %v2363_v39  ;;  %v2570_v18 = vld [vmem:[#allocation17_spill] sm:$0xff] }
 0x128   : > { %2560 = vst [vmem:[#allocation18_spill] sm:$0xff] %v2390_v54  ;;  %v669_v54 = vadd.f32 %v1458_v44, %v524_v53  ;;  %v529_v59 = vadd.f32 %v1381_v58, %v2388_v55  ;;  %v2408_v58 = vpop.f32.mrf.mxu1  ;;  %v684_v56 = vadd.f32 %v1467_v5, %v539_v3  ;;  %v559_v35 = vadd.f32 %v1399_v25, %v2388_v55  ;;  %v2567_v5 = vld [vmem:[#allocation12_spill] sm:$0xff] }
 0x129   : > { %v2393_v52 = vpop.f32.mrf.mxu0  ;;  %v699_v27 = vadd.f32 %v1476_v16, %v554_v14  ;;  %v1479_v37 = vadd.f32 %v2351_v32, %v2347_v30  ;;  %v574_v1 = vadd.f32 %v1408_v45, %v2388_v55  ;;  %v2569_v14 = vld [vmem:[#allocation4_spill] sm:$0xff]  ;;  %v2574_v45 = vld [vmem:[#allocation6_spill] sm:$0xff] }
 0x12a   : > { %v674_v8 = vadd.f32 %v1461_v2, %v529_v59  ;;  %v2561_v59 = vld [vmem:[#allocation11_spill] sm:$0xff]  ;;  %v2562_v2 = vld [vmem:[#allocation14_spill] sm:$0xff] }
 0x12b   : > { %v2398_v61 = vpop.f32.mrf.mxu0  ;;  %v1488_v30 = vadd.f32 %v2562_v2, %v2561_v59  ;;  %v704_v10 = vadd.f32 %v1479_v37, %v559_v35 }
 0x12d   : > { %v1631_v43 = vpop.f32.mrf.mxu0 }
 0x12e   : > { %v814_v62 = vadd.f32 %v1631_v43, %v669_v54  ;;  %v2419_v43 = vpop.f32.mrf.mxu1 }
 0x12f   : > { %v808_v0 = vpop.f32.mrf.mxu0  ;;  %v2572_v19 = vld [vmem:[#allocation18_spill] sm:$0xff] }
 0x130   : > { %v809_v7 = vadd.f32 %v808_v0, %v664_v57  ;;  %v888_v15 = vmax.f32 %v814_v62, 0.0  ;;  %v1496_v39 = vpop.f32.mrf.mxu1  ;;  %v2564_v57 = vld [vmem:[#allocation15_spill] sm:$0xff] }
 0x131   : > { %v1634_v53 = vpop.f32.mrf.mxu0 }
 0x132   : > { %v887_v6 = vmax.f32 %v809_v7, 0.0  ;;  %v824_v17 = vadd.f32 %v1634_v53, %v679_v12  ;;  %v1498_v9 = vpop.f32.mrf.mxu1 }
 0x133   : > { %v818_v54 = vpop.f32.mrf.mxu0 }
 0x134   : > { %v819_v42 = vadd.f32 %v818_v54, %v674_v8  ;;  %1685 = vmatprep.mubr.f32.mxu1 %v887_v6  ;;  %v890_v28 = vmax.f32 %v824_v17, 0.0  ;;  %v719_v8 = vadd.f32 %v1488_v30, %v574_v1  ;;  %v1494_v54 = vadd.f32 %v2408_v58, %v2403_v4  ;;  %v1499_v25 = vpop.f32.mrf.mxu1  ;;  %v2577_v1 = vld [vmem:[#allocation9_spill] sm:$0xff] }
 0x135   : > { %v1637_v23 = vpop.f32.mrf.mxu0  ;;  %1686 = vmatmul.mubr.f32.vlgmr.msra.gmra.mxu1 %v888_v15 }
 0x136   : > { %v889_v44 = vmax.f32 %v819_v42, 0.0  ;;  %1781 = vmatpush3.msra.mxu1 %v2249_v48  ;;  %v834_v31 = vadd.f32 %v1637_v23, %v689_v20  ;;  %v1482_v48 = vadd.f32 %v2357_v36, %v2353_v34  ;;  %v1485_v34 = vadd.f32 %v2365_v40, %v2361_v38  ;;  %v2565_v38 = vld [vmem:[#allocation2_spill] sm:$0xff]  ;;  %v2571_v23 = vld [vmem:[#allocation16_spill] sm:$0xff] }
 0x137   : > { %v828_v33 = vpop.f32.mrf.mxu0  ;;  %1766 = vmatprep.subr.mxu1 %v2254_v49  ;;  %v2566_v40 = vld [vmem:[#allocation10_spill] sm:$0xff]  ;;  %v1420_v42 = vadd.f32 %v2398_v61, %v2393_v52  ;;  %v1491_v20 = vadd.f32 %v2396_v60, %v2570_v18  ;;  %v1417_v21 = vadd.f32 %v2572_v19, %v2571_v23  ;;  %v2573_v52 = vld [vmem:[#allocation5_spill] sm:$0xff] }
 0x138   : > { %v829_v22 = vadd.f32 %v828_v33, %v684_v56  ;;  %1688 = vmatprep.mubr.f32.mxu1 %v889_v44  ;;  %1782 = vmatpush3.msra.mxu1 %v2254_v49  ;;  %v569_v49 = vadd.f32 %v1405_v26, %v2388_v55  ;;  %v892_v36 = vmax.f32 %v834_v31, 0.0  ;;  %v709_v0 = vadd.f32 %v1482_v48, %v564_v24 }
 0x139   : > { %v1640_v29 = vpop.f32.mrf.mxu0  ;;  %1689 = vmatmul.mubr.f32.gmra.mxu1 %v890_v28  ;;  %1767 = vmatprep.subr.mxu1 %v2262_v50  ;;  %v1411_v7 = vadd.f32 %v2567_v5, %v2566_v40  ;;  %v594_v28 = vadd.f32 %v1420_v42, %v2388_v55  ;;  %v1500_v31 = vadd.f32 %v1499_v25, %v1498_v9 }
 0x13a   : > { %v891_v41 = vmax.f32 %v829_v22, 0.0  ;;  %1783 = vmatpush3.msra.mxu1 %v2262_v50  ;;  %v844_v47 = vadd.f32 %v1640_v29, %v699_v27  ;;  %v2563_v50 = vld [vmem:[#allocation13_spill] sm:$0xff]  ;;  %v714_v15 = vadd.f32 %v1485_v34, %v569_v49  ;;  %v589_v22 = vadd.f32 %v1417_v21, %v2388_v55 }
 0x13b   : > { %v838_v63 = vpop.f32.mrf.mxu0  ;;  %1768 = vmatprep.subr.mxu1 %v2269_v51  ;;  %v1414_v62 = vadd.f32 %v2564_v57, %v2563_v50  ;;  %v579_v16 = vadd.f32 %v1411_v7, %v2388_v55  ;;  %v1497_v24 = vadd.f32 %v1496_v39, %v2419_v43  ;;  %v739_v49 = vadd.f32 %v1500_v31, %v594_v28  ;;  %v1089_v50 = vld [vmem:[%s2525_s5 + $0x10] sm:$0xff]  ;;  %v1088_v57 = vld [vmem:[%s2525_s5 + $0x8] sm:$0xff] }
 0x13c   : > { %v839_v32 = vadd.f32 %v838_v63, %v694_v46  ;;  %1691 = vmatprep.mubr.f32.mxu1 %v891_v41  ;;  %1784 = vmatpush3.msra.mxu1 %v2269_v51  ;;  %v894_v12 = vmax.f32 %v844_v47, 0.0  ;;  %v2568_v51 = vld [vmem:[#allocation3_spill] sm:$0xff] }
 0x13d   : > { %v1643_v3 = vpop.f32.mrf.mxu0  ;;  %1692 = vmatmul.mubr.f32.gmra.mxu1 %v892_v36  ;;  %1769 = vmatprep.subr.mxu1 %v2565_v38  ;;  %v584_v17 = vadd.f32 %v1414_v62, %v2388_v55  ;;  %v724_v27 = vadd.f32 %v1491_v20, %v579_v16  ;;  %v2575_v41 = vld [vmem:[#allocation7_spill] sm:$0xff]  ;;  %v2576_v36 = vld [vmem:[#allocation8_spill] sm:$0xff]  ;;  %v734_v43 = vadd.f32 %v1497_v24, %v589_v22  ;;  %v1087_v62 = vld [vmem:[%s2525_s5] sm:$0xff] }
 0x13e   : > { %v893_v11 = vmax.f32 %v839_v32, 0.0  ;;  %1785 = vmatpush3.msra.mxu1 %v2565_v38  ;;  %v854_v53 = vadd.f32 %v1643_v3, %v709_v0  ;;  %v1090_v32 = vld [vmem:[%s2525_s5 + $0x18] sm:$0xff]  ;;  %v1337_v0 = vld [vmem:[%s2524_s4] ss:$0 sm:$0xff] }
 0x13f   : > { %v848_v13 = vpop.f32.mrf.mxu0  ;;  %1770 = vmatprep.subr.mxu1 %v2568_v51  ;;  %v729_v60 = vadd.f32 %v1494_v54, %v584_v17  ;;  %1733 = vmatprep.subr.mxu0 %v1090_v32 }
 0x140   : > { %v849_v6 = vadd.f32 %v848_v13, %v704_v10  ;;  %1694 = vmatprep.mubr.f32.mxu1 %v893_v11  ;;  %1786 = vmatpush3.msra.mxu1 %v2568_v51  ;;  %v896_v4 = vmax.f32 %v854_v53, 0.0 }
 0x141   : > { %v1646_v56 = vpop.f32.mrf.mxu0  ;;  %1695 = vmatmul.mubr.f32.gmra.mxu1 %v894_v12  ;;  %1771 = vmatprep.subr.mxu1 %v2569_v14 }
 0x142   : > { %v895_v44 = vmax.f32 %v849_v6, 0.0  ;;  %1787 = vmatpush3.msra.mxu1 %v2569_v14  ;;  %v864_v58 = vadd.f32 %v1646_v56, %v719_v8  ;;  %1734 = vmatpush3.msra.mxu0 %v1090_v32 }
 0x143   : > { %v858_v26 = vpop.f32.mrf.mxu0  ;;  %1772 = vmatprep.subr.mxu1 %v2573_v52  ;;  %1735 = vmatprep.subr.mxu0 %v1089_v50 }
 0x144   : > { %v859_v61 = vadd.f32 %v858_v26, %v714_v15  ;;  %1697 = vmatprep.mubr.f32.mxu1 %v895_v44  ;;  %1788 = vmatpush3.msra.mxu1 %v2573_v52  ;;  %v898_v29 = vmax.f32 %v864_v58, 0.0 }
 0x145   : > { %v1649_v33 = vpop.f32.mrf.mxu0  ;;  %1698 = vmatmul.mubr.f32.gmra.mxu1 %v896_v4  ;;  %1773 = vmatprep.subr.mxu1 %v2574_v45 }
 0x146   : > { %v897_v48 = vmax.f32 %v859_v61, 0.0  ;;  %1789 = vmatpush3.msra.mxu1 %v2574_v45  ;;  %v874_v35 = vadd.f32 %v1649_v33, %v729_v60  ;;  %1736 = vmatpush3.msra.mxu0 %v1089_v50 }
 0x147   : > { %v868_v37 = vpop.f32.mrf.mxu0  ;;  %1774 = vmatprep.subr.mxu1 %v2575_v41  ;;  %1737 = vmatprep.subr.mxu0 %v1088_v57 }
 0x148   : > { %v869_v46 = vadd.f32 %v868_v37, %v724_v27  ;;  %1700 = vmatprep.mubr.f32.mxu1 %v897_v48  ;;  %1790 = vmatpush3.msra.mxu1 %v2575_v41  ;;  %v900_v39 = vmax.f32 %v874_v35, 0.0 }
 0x149   : > { %v1652_v34 = vpop.f32.mrf.mxu0  ;;  %1701 = vmatmul.mubr.f32.gmra.mxu1 %v898_v29  ;;  %1775 = vmatprep.subr.mxu1 %v2576_v36 }
 0x14a   : > { %v899_v55 = vmax.f32 %v869_v46, 0.0  ;;  %1791 = vmatpush3.msra.mxu1 %v2576_v36  ;;  %v884_v47 = vadd.f32 %v1652_v34, %v739_v49  ;;  %1738 = vmatpush3.msra.mxu0 %v1088_v57  ;;  %v1338_v34 = vld [vmem:[%s2526_s6] ss:$0 sm:$0xff] }
 0x14b   : > { %v878_v63 = vpop.f32.mrf.mxu0  ;;  %1776 = vmatprep.subr.mxu1 %v2577_v1  ;;  %1739 = vmatprep.subr.mxu0 %v1087_v62 }
 0x14c   : > { %v879_v59 = vadd.f32 %v878_v63, %v734_v43  ;;  %1703 = vmatprep.mubr.f32.mxu1 %v899_v55  ;;  %1792 = vmatpush3.msra.mxu1 %v2577_v1  ;;  %v902_v30 = vmax.f32 %v884_v47, 0.0 }
 0x14d   : > { %1704 = vmatmul.mubr.f32.gmra.mxu1 %v900_v39  ;;  %1777 = vmatprep.subr.mxu1 %v1090_v32 }
 0x14e   : > { %v901_v2 = vmax.f32 %v879_v59, 0.0  ;;  %1793 = vmatpush3.msra.mxu1 %v1090_v32  ;;  %1740 = vmatpush3.msra.mxu0 %v1087_v62 }
 0x14f   : > { %1778 = vmatprep.subr.mxu1 %v1089_v50 }
 0x150   : > { %1706 = vmatprep.mubr.f32.mxu1 %v901_v2  ;;  %1794 = vmatpush3.msra.mxu1 %v1089_v50 }
 0x151   : > { %1707 = vmatmul.mubr.f32.gmra.mxu1 %v902_v30  ;;  %1779 = vmatprep.subr.mxu1 %v1088_v57 }
 0x152   : > { %1795 = vmatpush3.msra.mxu1 %v1088_v57 }
 0x153   : > { %1780 = vmatprep.subr.mxu1 %v1087_v62 }
 0x154   : > { %1796 = vmatpush3.msra.mxu1 %v1087_v62 }
 0x1f5   : > { %v1687_v3 = vpop.f32.mrf.mxu1 }
 0x1f6   : > { %v998_v38 = vadd.f32 %v1687_v3, %v1337_v0 }
 0x1f7   : > { %v992_v40 = vpop.f32.mrf.mxu1 }
 0x1f8   : > { %v993_v5 = vadd.f32 %v1337_v0, %v992_v40  ;;  %v1072_v11 = vmax.f32 %v998_v38, 0.0 }
 0x1f9   : > { %v1690_v7 = vpop.f32.mrf.mxu1 }
 0x1fa   : > { %v1071_v9 = vmax.f32 %v993_v5, 0.0  ;;  %v1008_v10 = vadd.f32 %v1690_v7, %v1337_v0 }
 0x1fb   : > { %v1002_v12 = vpop.f32.mrf.mxu1 }
 0x1fc   : > { %v1003_v53 = vadd.f32 %v1337_v0, %v1002_v12  ;;  %1741 = vmatprep.mubr.f32.mxu0 %v1071_v9  ;;  %v1074_v6 = vmax.f32 %v1008_v10, 0.0 }
 0x1fd   : > { %v1693_v13 = vpop.f32.mrf.mxu1  ;;  %1742 = vmatmul.mubr.f32.vlgmr.msra.gmra.mxu0 %v1072_v11 }
 0x1fe   : > { %v1073_v51 = vmax.f32 %v1003_v53, 0.0  ;;  %v1018_v8 = vadd.f32 %v1693_v13, %v1337_v0 }
 0x1ff   : > { %v1012_v15 = vpop.f32.mrf.mxu1 }
 0x200   : > { %v1013_v17 = vadd.f32 %v1337_v0, %v1012_v15  ;;  %1744 = vmatprep.mubr.f32.mxu0 %v1073_v51  ;;  %v1076_v56 = vmax.f32 %v1018_v8, 0.0 }
 0x201   : > { %v1696_v54 = vpop.f32.mrf.mxu1  ;;  %1745 = vmatmul.mubr.f32.gmra.mxu0 %v1074_v6 }
 0x202   : > { %v1075_v42 = vmax.f32 %v1013_v17, 0.0  ;;  %v1028_v14 = vadd.f32 %v1696_v54, %v1337_v0 }
 0x203   : > { %v1022_v16 = vpop.f32.mrf.mxu1 }
 0x204   : > { %v1023_v18 = vadd.f32 %v1337_v0, %v1022_v16  ;;  %1747 = vmatprep.mubr.f32.mxu0 %v1075_v42  ;;  %v1078_v19 = vmax.f32 %v1028_v14, 0.0 }
 0x205   : > { %v1699_v20 = vpop.f32.mrf.mxu1  ;;  %1748 = vmatmul.mubr.f32.gmra.mxu0 %v1076_v56 }
 0x206   : > { %v1077_v23 = vmax.f32 %v1023_v18, 0.0  ;;  %v1038_v21 = vadd.f32 %v1699_v20, %v1337_v0 }
 0x207   : > { %v1032_v25 = vpop.f32.mrf.mxu1 }
 0x208   : > { %v1033_v44 = vadd.f32 %v1337_v0, %v1032_v25  ;;  %1750 = vmatprep.mubr.f32.mxu0 %v1077_v23  ;;  %v1080_v26 = vmax.f32 %v1038_v21, 0.0 }
 0x209   : > { %v1702_v4 = vpop.f32.mrf.mxu1  ;;  %1751 = vmatmul.mubr.f32.gmra.mxu0 %v1078_v19 }
 0x20a   : > { %v1079_v58 = vmax.f32 %v1033_v44, 0.0  ;;  %v1048_v52 = vadd.f32 %v1702_v4, %v1337_v0 }
 0x20b   : > { %v1042_v61 = vpop.f32.mrf.mxu1 }
 0x20c   : > { %v1043_v28 = vadd.f32 %v1337_v0, %v1042_v61  ;;  %1753 = vmatprep.mubr.f32.mxu1 %v1079_v58  ;;  %v1082_v33 = vmax.f32 %v1048_v52, 0.0 }
 0x20d   : > { %v1705_v31 = vpop.f32.mrf.mxu1  ;;  %1754 = vmatmul.mubr.f32.vlgmr.msra.gmra.mxu1 %v1080_v26 }
 0x20e   : > { %v1081_v60 = vmax.f32 %v1043_v28, 0.0  ;;  %v1058_v45 = vadd.f32 %v1705_v31, %v1337_v0 }
 0x20f   : > { %v1052_v22 = vpop.f32.mrf.mxu1 }
 0x210   : > { %v1053_v24 = vadd.f32 %v1337_v0, %v1052_v22  ;;  %1756 = vmatprep.mubr.f32.mxu1 %v1081_v60  ;;  %v1084_v29 = vmax.f32 %v1058_v45, 0.0 }
 0x211   : > { %v1708_v48 = vpop.f32.mrf.mxu1  ;;  %1757 = vmatmul.mubr.f32.gmra.mxu1 %v1082_v33 }
 0x212   : > { %v1083_v27 = vmax.f32 %v1053_v24, 0.0  ;;  %v1068_v35 = vadd.f32 %v1708_v48, %v1337_v0 }
 0x213   : > { %v1062_v37 = vpop.f32.mrf.mxu1 }
 0x214   : > { %v1063_v41 = vadd.f32 %v1337_v0, %v1062_v37  ;;  %1759 = vmatprep.mubr.f32.mxu1 %v1083_v27  ;;  %v1086_v49 = vmax.f32 %v1068_v35, 0.0 }
 0x215   : > { %1760 = vmatmul.mubr.f32.gmra.mxu1 %v1084_v29 }
 0x216   : > { %v1085_v46 = vmax.f32 %v1063_v41, 0.0 }
 0x218   : > { %1762 = vmatprep.mubr.f32.mxu1 %v1085_v46 }
 0x219   : > { %1763 = vmatmul.mubr.f32.gmra.mxu1 %v1086_v49 }
 0x2bd   : > { %v1743_v36 = vpop.f32.mrf.mxu0 }
 0x2be   : > { %v1182_v55 = vadd.f32 %v1743_v36, %v1338_v34 }
 0x2bf   : > { %v1176_v43 = vpop.f32.mrf.mxu0 }
 0x2c0   : > { %1256 = vst [vmem:[%s2499_s13 + $0x8] sm:$0xff] %v1182_v55  ;;  %v1177_v39 = vadd.f32 %v1338_v34, %v1176_v43 }
 0x2c1   : > { %v1746_v47 = vpop.f32.mrf.mxu0 }
 0x2c2   : > { %1255 = vst [vmem:[%s2499_s13] sm:$0xff] %v1177_v39  ;;  %v1192_v63 = vadd.f32 %v1746_v47, %v1338_v34 }
 0x2c3   : > { %v1186_v1 = vpop.f32.mrf.mxu0 }
 0x2c4   : > { %1258 = vst [vmem:[%s2499_s13 + $0x18] sm:$0xff] %v1192_v63  ;;  %v1187_v59 = vadd.f32 %v1338_v34, %v1186_v1 }
 0x2c5   : > { %v1749_v2 = vpop.f32.mrf.mxu0 }
 0x2c6   : > { %1257 = vst [vmem:[%s2499_s13 + $0x10] sm:$0xff] %v1187_v59  ;;  %v1202_v30 = vadd.f32 %v1749_v2, %v1338_v34 }
 0x2c7   : > { %v1196_v32 = vpop.f32.mrf.mxu0 }
 0x2c8   : > { %1260 = vst [vmem:[%s2499_s13 + $0x28] sm:$0xff] %v1202_v30  ;;  %v1197_v50 = vadd.f32 %v1338_v34, %v1196_v32 }
 0x2c9   : > { %v1752_v57 = vpop.f32.mrf.mxu0 }
 0x2ca   : > { %1259 = vst [vmem:[%s2499_s13 + $0x20] sm:$0xff] %v1197_v50  ;;  %v1212_v62 = vadd.f32 %v1752_v57, %v1338_v34 }
 0x2cb   : > { %v1206_v0 = vpop.f32.mrf.mxu0 }
 0x2cc   : > { %1262 = vst [vmem:[%s2499_s13 + $0x38] sm:$0xff] %v1212_v62  ;;  %v1207_v3 = vadd.f32 %v1338_v34, %v1206_v0 }
 0x2cd   : > { %v1755_v38 = vpop.f32.mrf.mxu1 }
 0x2ce   : > { %1261 = vst [vmem:[%s2499_s13 + $0x30] sm:$0xff] %v1207_v3  ;;  %v1222_v40 = vadd.f32 %v1755_v38, %v1338_v34 }
 0x2cf   : > { %v1216_v5 = vpop.f32.mrf.mxu1 }
 0x2d0   : > { %1264 = vst [vmem:[%s2499_s13 + $0x48] sm:$0xff] %v1222_v40  ;;  %v1217_v7 = vadd.f32 %v1338_v34, %v1216_v5 }
 0x2d1   : > { %v1758_v9 = vpop.f32.mrf.mxu1 }
 0x2d2   : > { %1263 = vst [vmem:[%s2499_s13 + $0x40] sm:$0xff] %v1217_v7  ;;  %v1232_v11 = vadd.f32 %v1758_v9, %v1338_v34 }
 0x2d3   : > { %v1226_v10 = vpop.f32.mrf.mxu1 }
 0x2d4   : > { %1266 = vst [vmem:[%s2499_s13 + $0x58] sm:$0xff] %v1232_v11  ;;  %v1227_v12 = vadd.f32 %v1338_v34, %v1226_v10 }
 0x2d5   : > { %v1761_v53 = vpop.f32.mrf.mxu1 }
 0x2d6   : > { %1265 = vst [vmem:[%s2499_s13 + $0x50] sm:$0xff] %v1227_v12  ;;  %v1242_v13 = vadd.f32 %v1761_v53, %v1338_v34 }
 0x2d7   : > { %v1236_v51 = vpop.f32.mrf.mxu1 }
 0x2d8   : > { %1268 = vst [vmem:[%s2499_s13 + $0x68] sm:$0xff] %v1242_v13  ;;  %v1237_v6 = vadd.f32 %v1338_v34, %v1236_v51 }
 0x2d9   : > { %v1764_v8 = vpop.f32.mrf.mxu1 }
 0x2da   : > { %1267 = vst [vmem:[%s2499_s13 + $0x60] sm:$0xff] %v1237_v6  ;;  %v1252_v15 = vadd.f32 %v1764_v8, %v1338_v34 }
 0x2db   : > { %v1246_v17 = vpop.f32.mrf.mxu1 }
 0x2dc   : > { %1270 = vst [vmem:[%s2499_s13 + $0x78] sm:$0xff] %v1252_v15  ;;  %v1247_v54 = vadd.f32 %v1338_v34, %v1246_v17 }
 0x2de   : > { %1269 = vst [vmem:[%s2499_s13 + $0x70] sm:$0xff] %v1247_v54 }
 0x2df PF: > { %s17_s24 = sadd.s32 1, %s1812_s24  }
 0x2e0   : > { %p14_p4 = scmp.ge.s32.totalorder %s17_s24, 4  }
 0x2e2   :  { %16 = sbr.rel (!%p14_p4) target bundleno = 1 (0x1), region = 78 }

</bundles_post_ra>
